<compile_context>
chip_gen: v5e
topology: v5e:2x2
jax: 0.10.0
libtpu: 0.0.40
codegen_flags: <defaults>
</compile_context>

<pallas_src>
import math
import functools

import jax
import jax.numpy as jnp
from jax import lax
from jax.experimental import pallas as pl
from jax.experimental.pallas import tpu as pltpu


def _round_up(x, m):
    return ((x + m - 1) // m) * m


def _sublane_multiple(dtype):
    # 8 sublanes of 32-bit; sub-32-bit dtypes pack along sublanes.
    bits = jnp.dtype(dtype).itemsize * 8
    return max(8, 256 // bits)  # f32 -> 8, bf16 -> 16, int8/fp8 -> 32


def _vmem_budget_bytes():
    # ~75% of per-core VMEM; conservative fallback = v7x (64 MiB per TC).
    try:
        cap = int(pltpu.get_tpu_info().vmem_capacity_bytes)
    except Exception:
        cap = 64 * 1024 * 1024
    return (cap * 3) // 4


def _working_set_bytes(tn, tc, tf, in_item, out_item):
    # Double-buffered x, w, bias, out tiles + one f32 accumulator scratch.
    dbl = 2 * ((tn * tf + tc * tf + tc) * in_item + tn * tc * out_item)
    return dbl + tn * tc * 4


def _select_tiles(N, C, F, in_item, out_item, sub, budget):
    tile_n = min(_round_up(N, sub), 256)
    tile_c = min(_round_up(C, 128), 512)
    tile_f = min(_round_up(F, 128), 2048)
    while _working_set_bytes(tile_n, tile_c, tile_f, in_item, out_item) > budget:
        if tile_f > 512:
            tile_f //= 2          # K-split first: keeps MXU-shaped (>=128) tiles
        elif tile_c > 256:
            tile_c //= 2
        elif tile_n > max(sub, 64):
            tile_n = max(sub, tile_n // 2)
        elif tile_c > 128:
            tile_c //= 2
        elif tile_f > 128:
            tile_f //= 2
        elif tile_n > sub:
            tile_n = max(sub, tile_n // 2)
        else:
            break
    return tile_n, tile_c, tile_f


def _logits_kernel(x_ref, w_ref, b_ref, o_ref, acc_ref, *, inv_temp):
    # x_ref: [tn, tf], w_ref: [tc, tf], b_ref: [1, tc], o_ref: [tn, tc]
    k = pl.program_id(2)

    @pl.when(k == 0)
    def _():
        acc_ref[...] = jnp.zeros_like(acc_ref)

    acc_ref[...] += lax.dot_general(
        x_ref[...],
        w_ref[...],
        dimension_numbers=(((1,), (1,)), ((), ())),  # contract feature dims (MXU)
        preferred_element_type=jnp.float32,
    )

    @pl.when(k == pl.num_programs(2) - 1)
    def _():
        logits = (acc_ref[...] + b_ref[...].astype(jnp.float32)) * inv_temp
        o_ref[...] = logits.astype(o_ref.dtype)


def softmax_loss_first_part(features, weights, bias, temperature=1.0, *,
                            tile_n=None, tile_c=None, tile_f=None,
                            compute_dtype=None, out_dtype=None):
    """features: [N, F], weights: [C, F], bias: [C] -> logits [N, C]."""
    if float(temperature) == 0.0:
        raise ValueError("temperature must be non-zero")
    N, F = features.shape
    C, F2 = weights.shape
    assert F == F2, "feature dim mismatch"

    out_dtype = out_dtype if out_dtype is not None else features.dtype
    if compute_dtype is not None:
        # e.g. jnp.bfloat16 to hit full MXU rate; accumulation stays f32.
        features = features.astype(compute_dtype)
        weights = weights.astype(compute_dtype)

    in_item = jnp.dtype(features.dtype).itemsize
    out_item = jnp.dtype(out_dtype).itemsize
    sub = _sublane_multiple(features.dtype)

    budget = _vmem_budget_bytes()
    tn, tc, tf = _select_tiles(N, C, F, in_item, out_item, sub, budget)
    if tile_n is not None:
        tn = _round_up(tile_n, sub)
    if tile_c is not None:
        tc = _round_up(tile_c, 128)
    if tile_f is not None:
        tf = _round_up(tile_f, 128)

    Np = _round_up(N, tn)
    Cp = _round_up(C, tc)
    Fp = _round_up(F, tf)
    n_n, n_c, n_k = Np // tn, Cp // tc, Fp // tf

    # Megacore: make sure the parallel axes expose >= 2 blocks for non-tiny heads.
    if n_n * n_c == 1 and Cp >= 256 and tc >= 256:
        tc //= 2
        Cp = _round_up(C, tc)
        n_c = Cp // tc

    # Zero-pad to tile multiples (padded features contribute 0 to the dot,
    # padded classes give 0-logits and are sliced off below).
    x = features
    if (Np, Fp) != (N, F):
        x = jnp.pad(x, ((0, Np - N), (0, Fp - F)))
    w = weights
    if (Cp, Fp) != (C, F):
        w = jnp.pad(w, ((0, Cp - C), (0, Fp - F)))
    b = bias if Cp == C else jnp.pad(bias, (0, Cp - C))
    b2 = b.reshape(1, Cp)

    kernel = functools.partial(_logits_kernel, inv_temp=1.0 / float(temperature))

    # Adaptive loop order: keep the LARGER operand on the outer (resident) axis,
    # stream the smaller one on the inner axis -> minimal HBM read traffic.
    stream_x_cost = Np * Fp * n_c   # x re-streamed once per class tile
    stream_w_cost = Cp * Fp * n_n   # w re-streamed once per row tile
    if stream_x_cost <= stream_w_cost:
        grid = (n_c, n_n, n_k)
        x_map = lambda cj, ni, kk: (ni, kk)
        w_map = lambda cj, ni, kk: (cj, kk)
        b_map = lambda cj, ni, kk: (0, cj)
        o_map = lambda cj, ni, kk: (ni, cj)
    else:
        grid = (n_n, n_c, n_k)
        x_map = lambda ni, cj, kk: (ni, kk)
        w_map = lambda ni, cj, kk: (cj, kk)
        b_map = lambda ni, cj, kk: (0, cj)
        o_map = lambda ni, cj, kk: (ni, cj)

    ws = _working_set_bytes(tn, tc, tf, in_item, out_item)
    vmem_limit = int(min(budget, max(2 * ws, 32 * 1024 * 1024)))

    out_padded = pl.pallas_call(
        kernel,
        out_shape=jax.ShapeDtypeStruct((Np, Cp), out_dtype),
        grid_spec=pltpu.PrefetchScalarGridSpec(
            num_scalar_prefetch=0,
            grid=grid,
            in_specs=[
                pl.BlockSpec((tn, tf), x_map),    # activations
                pl.BlockSpec((tc, tf), w_map),    # weight tile
                pl.BlockSpec((1, tc), b_map),     # bias tile
            ],
            out_specs=pl.BlockSpec((tn, tc), o_map),
            scratch_shapes=[pltpu.VMEM((tn, tc), jnp.float32)],  # f32 accumulator
        ),
        compiler_params=pltpu.CompilerParams(
            dimension_semantics=("parallel", "parallel", "arbitrary"),
            vmem_limit_bytes=vmem_limit,
        ),
    )(x, w, b2)

    if (Np, Cp) != (N, C):
        out_padded = out_padded[:N, :C]
    return out_padded


if __name__ == "__main__":
    # Small shapes consistent with a Linear(num_features -> num_classes) head.
    batch = 8
    num_features = 32
    num_classes = 16
    temperature = 2.0

    key = jax.random.PRNGKey(0)
    k_x, k_w = jax.random.split(key)

    features = jax.random.normal(k_x, (batch, num_features), dtype=jnp.float32)

    # Deterministic parameter init matching the PyTorch module's __init__:
    #   weights ~ U(-sqrt(1/num_features), sqrt(1/num_features)), bias = 0
    bound = math.sqrt(1.0 / num_features)
    weights = jax.random.uniform(
        k_w, (num_classes, num_features), minval=-bound, maxval=bound,
        dtype=jnp.float32,
    )
    bias = jnp.zeros((num_classes,), dtype=jnp.float32)

    out = softmax_loss_first_part(features, weights, bias, temperature)
    out = jax.block_until_ready(out)

    # Pure-JAX reference check.
    ref = (features @ weights.T + bias) / temperature
    assert out.shape == (batch, num_classes)
    assert jnp.allclose(out, ref, atol=1e-5, rtol=1e-5), "mismatch vs reference"

    print("KERNEL_OK")
</pallas_src>

<mosaic_0001>
module attributes {stable_mosaic.version = 11 : i64} {
  func.func @_logits_kernel(%arg0: i32, %arg1: i32, %arg2: i32, %arg3: memref<8x128xf32, #tpu.memory_space<vmem>>, %arg4: memref<128x128xf32, #tpu.memory_space<vmem>>, %arg5: memref<1x128xf32, #tpu.memory_space<vmem>>, %arg6: memref<8x128xf32, #tpu.memory_space<vmem>>, %arg7: memref<8x128xf32, #tpu.memory_space<vmem>>) attributes {dimension_semantics = [#tpu.dimension_semantics<parallel>, #tpu.dimension_semantics<parallel>, #tpu.dimension_semantics<arbitrary>], iteration_bounds = array<i64: 1, 1, 1>, scalar_prefetch = 0 : i64, scratch_operands = 1 : i64, tpu.core_type = #tpu.core_type<tc>, window_params = [{transform_indices = @transform_0, window_bounds = array<i64: 8, 128>}, {transform_indices = @transform_1, window_bounds = array<i64: 128, 128>}, {transform_indices = @transform_2, window_bounds = array<i64: 1, 128>}, {transform_indices = @transform_3, window_bounds = array<i64: 8, 128>}]} {
    %c0_i32 = arith.constant 0 : i32
    %0 = arith.cmpi eq, %arg2, %c0_i32 : i32
    %1 = arith.extui %0 : i1 to i32
    %c0_i32_0 = arith.constant 0 : i32
    %2 = arith.cmpi ne, %1, %c0_i32_0 : i32
    scf.if %2 {
      %cst_10 = arith.constant 0.000000e+00 : f32
      %12 = vector.broadcast %cst_10 : f32 to vector<8x128xf32>
      %c0_11 = arith.constant 0 : index
      %c0_12 = arith.constant 0 : index
      %13 = vector.load %arg7[%c0_11, %c0_12] : memref<8x128xf32, #tpu.memory_space<vmem>>, vector<8x128xf32>
      tpu.vector_store %arg7[%c0_11, %c0_12], %12 {strides = array<i32>} : memref<8x128xf32, #tpu.memory_space<vmem>>, vector<8x128xf32>,
    } else {
    }
    %c0 = arith.constant 0 : index
    %c0_1 = arith.constant 0 : index
    %3 = vector.load %arg7[%c0, %c0_1] : memref<8x128xf32, #tpu.memory_space<vmem>>, vector<8x128xf32>
    %c0_2 = arith.constant 0 : index
    %c0_3 = arith.constant 0 : index
    %4 = vector.load %arg3[%c0_2, %c0_3] : memref<8x128xf32, #tpu.memory_space<vmem>>, vector<8x128xf32>
    %c0_4 = arith.constant 0 : index
    %c0_5 = arith.constant 0 : index
    %5 = vector.load %arg4[%c0_4, %c0_5] : memref<128x128xf32, #tpu.memory_space<vmem>>, vector<128x128xf32>
    %cst = arith.constant dense<0.000000e+00> : vector<8x128xf32>
    %6 = tpu.matmul %4, %5, %cst {dimension_numbers = #tpu.dot_dimension_numbers<[1], [1], [0], [0], [0, 0, 1, 0], [], []>} : vector<8x128xf32>, vector<128x128xf32>, vector<8x128xf32> -> vector<8x128xf32>
    %7 = arith.addf %3, %6 : vector<8x128xf32>
    %c0_6 = arith.constant 0 : index
    %c0_7 = arith.constant 0 : index
    %8 = vector.load %arg7[%c0_6, %c0_7] : memref<8x128xf32, #tpu.memory_space<vmem>>, vector<8x128xf32>
    tpu.vector_store %arg7[%c0_6, %c0_7], %7 {strides = array<i32>} : memref<8x128xf32, #tpu.memory_space<vmem>>, vector<8x128xf32>,
    %c0_i32_8 = arith.constant 0 : i32
    %9 = arith.cmpi eq, %arg2, %c0_i32_8 : i32
    %10 = arith.extui %9 : i1 to i32
    %c0_i32_9 = arith.constant 0 : i32
    %11 = arith.cmpi ne, %10, %c0_i32_9 : i32
    scf.if %11 {
      %c0_10 = arith.constant 0 : index
      %c0_11 = arith.constant 0 : index
      %12 = vector.load %arg7[%c0_10, %c0_11] : memref<8x128xf32, #tpu.memory_space<vmem>>, vector<8x128xf32>
      %c0_12 = arith.constant 0 : index
      %c0_13 = arith.constant 0 : index
      %13 = vector.load %arg5[%c0_12, %c0_13] : memref<1x128xf32, #tpu.memory_space<vmem>>, vector<1x128xf32>
      %14 = vector.broadcast %13 : vector<1x128xf32> to vector<8x128xf32>
      %15 = arith.addf %12, %14 : vector<8x128xf32>
      %cst_14 = arith.constant 5.000000e-01 : f32
      %16 = vector.broadcast %cst_14 : f32 to vector<8x128xf32>
      %17 = arith.mulf %15, %16 : vector<8x128xf32>
      %c0_15 = arith.constant 0 : index
      %c0_16 = arith.constant 0 : index
      %18 = vector.load %arg6[%c0_15, %c0_16] : memref<8x128xf32, #tpu.memory_space<vmem>>, vector<8x128xf32>
      tpu.vector_store %arg6[%c0_15, %c0_16], %17 {strides = array<i32>} : memref<8x128xf32, #tpu.memory_space<vmem>>, vector<8x128xf32>,
    } else {
    }
    return
  }
  func.func @transform_0(%arg0: i32, %arg1: i32, %arg2: i32) -> (i32, i32) {
    %c0_i32 = arith.constant 0 : i32
    return %arg1, %arg2 : i32, i32
  }
  func.func @transform_1(%arg0: i32, %arg1: i32, %arg2: i32) -> (i32, i32) {
    %c0_i32 = arith.constant 0 : i32
    return %arg0, %arg2 : i32, i32
  }
  func.func @transform_2(%arg0: i32, %arg1: i32, %arg2: i32) -> (i32, i32) {
    %c0_i32 = arith.constant 0 : i32
    %c0_i32_0 = arith.constant 0 : i32
    return %c0_i32, %arg0 : i32, i32
  }
  func.func @transform_3(%arg0: i32, %arg1: i32, %arg2: i32) -> (i32, i32) {
    %c0_i32 = arith.constant 0 : i32
    return %arg1, %arg0 : i32, i32
  }
}

</mosaic_0001>

<bundles_post_ra>
// kernel: tpu_custom_call.1
= control target key start
LH: loop header
LB: loop body
LE: loop exit
PB: predicated region body
PF: predicated region fallthrough
CT: control target
= control target key end

     0   :  { %8 = vsyncpa [#allocation4], 0  ;;  %s240_s0 = inlined_call_operand.hbm [shape: f32[8,128], index: 0, kind: input, shape index: {}]   ;;  %s241_s1 = inlined_call_operand.hbm [shape: f32[128,128], index: 1, kind: input, shape index: {}]   ;;  %s242_s2 = inlined_call_operand.vmem [shape: f32[1,128], index: 2, kind: input, shape index: {}]   ;;  %s243_s3 = inlined_call_operand.hbm [shape: f32[8,128], index: 3, kind: output, shape index: {}]  }
   0x1   :  { %9 = vsyncpa [#allocation7], 0 }
   0x2   :  { %10 = vsyncpa [#allocation5], 0  ;;  %s16_s14 = sshll.u32 %s240_s0, 4  ;;  %s203_s15 = smov [#allocation3]   ;;  %s17_s14 = int_to_ptr.hbm [resolvable:$true] %s16_s14 }
   0x3   :  { %s18_s16 = sshll.u32 %s203_s15, 4  ;;  %s26_s19 = sshll.u32 %s241_s1, 4  ;;  %s19_s16 = int_to_ptr.vmem [resolvable:$true] %s18_s16  ;;  %s27_s19 = int_to_ptr.hbm [resolvable:$true] %s26_s19 }
   0x4   :  { %21 = dma.hbm_to_vmem [thread:$0]  %s17_s14, 128, %s19_s16, [#allocation4]  }
   0x5   :  { %s204_s20 = smov [#allocation6]   ;;  %s205_s22 = smov 128  }
   0x6   :  { %s28_s21 = sshll.u32 %s204_s20, 4  ;;  %s206_s23 = smov 8   ;;  %s29_s21 = int_to_ptr.vmem [resolvable:$true] %s28_s21 }
   0x7   :  { %34 = dma.hbm_to_vmem [thread:$0]  %s27_s19, 2048, %s29_s21, [#allocation7], %s205_s22, %s205_s22, %s206_s23  }
   0x8   :  { %197 = dma.done.wait [#allocation4], 128  }
   0x9   :  { %198 = vsyncadd [#allocation4], 4294967168 }
   0xa   :  { %199 = dma.done.wait [#allocation7], 2048  }
   0xb   :  { %200 = vsyncadd [#allocation7], 4294965248  ;;  %v67_v0 = vld [vmem:[#allocation6 + $0x78] sm:$0xff]  ;;  %v66_v1 = vld [vmem:[#allocation6 + $0x70] sm:$0xff]  ;;  %s207_s24 = smov [#allocation8]   ;;  %s108_s28 = sshll.u32 %s243_s3, 4  ;;  %s109_s28 = int_to_ptr.hbm [resolvable:$true] %s108_s28 }
   0xc   :  { %68 = vmatpush.xpose.msra.mxu0 %v67_v0  ;;  %v65_v2 = vld [vmem:[#allocation6 + $0x68] sm:$0xff]  ;;  %v64_v3 = vld [vmem:[#allocation6 + $0x60] sm:$0xff]  ;;  %v63_v4 = vld [vmem:[#allocation6 + $0x58] sm:$0xff]  ;;  %s106_s25 = sshll.u32 %s207_s24, 4  ;;  %s107_s25 = int_to_ptr.vmem [resolvable:$true] %s106_s25 }
   0xd   :  { %v62_v5 = vld [vmem:[#allocation6 + $0x50] sm:$0xff]  ;;  %v61_v6 = vld [vmem:[#allocation6 + $0x48] sm:$0xff]  ;;  %v60_v7 = vld [vmem:[#allocation6 + $0x40] sm:$0xff] }
   0xe   :  { %v59_v8 = vld [vmem:[#allocation6 + $0x38] sm:$0xff]  ;;  %v58_v9 = vld [vmem:[#allocation6 + $0x30] sm:$0xff]  ;;  %v57_v10 = vld [vmem:[#allocation6 + $0x28] sm:$0xff] }
   0xf   :  { %v56_v11 = vld [vmem:[#allocation6 + $0x20] sm:$0xff]  ;;  %v55_v12 = vld [vmem:[#allocation6 + $0x18] sm:$0xff]  ;;  %v54_v13 = vld [vmem:[#allocation6 + $0x10] sm:$0xff] }
  0x10   :  { %69 = vmatpush.xpose.msra.mxu0 %v66_v1  ;;  %v53_v14 = vld [vmem:[#allocation6 + $0x8] sm:$0xff]  ;;  %v52_v15 = vld [vmem:[#allocation6] sm:$0xff]  ;;  %v51_v16 = vld [vmem:[#allocation3] sm:$0xff] }
  0x11   :  { %v124_v17 = vld [vmem:[%s242_s2] ss:$0 sm:$0xff] }
  0x14   :  { %70 = vmatpush.xpose.msra.mxu0 %v65_v2 }
  0x18   :  { %71 = vmatpush.xpose.msra.mxu0 %v64_v3 }
  0x1c   :  { %72 = vmatpush.xpose.msra.mxu0 %v63_v4 }
  0x20   :  { %73 = vmatpush.xpose.msra.mxu0 %v62_v5 }
  0x24   :  { %74 = vmatpush.xpose.msra.mxu0 %v61_v6 }
  0x28   :  { %75 = vmatpush.xpose.msra.mxu0 %v60_v7 }
  0x2c   :  { %76 = vmatpush.xpose.msra.mxu0 %v59_v8 }
  0x30   :  { %77 = vmatpush.xpose.msra.mxu0 %v58_v9 }
  0x34   :  { %78 = vmatpush.xpose.msra.mxu0 %v57_v10 }
  0x38   :  { %79 = vmatpush.xpose.msra.mxu0 %v56_v11 }
  0x3c   :  { %80 = vmatpush.xpose.msra.mxu0 %v55_v12 }
  0x40   :  { %81 = vmatpush.xpose.msra.mxu0 %v54_v13 }
  0x44   :  { %82 = vmatpush.xpose.msra.mxu0 %v53_v14 }
  0x48   :  { %83 = vmatpush.xpose.msra.mxu0 %v52_v15 }
  0x4b   :  { %84 = vmatmul.f32.vlgmr.msra.gmra.mxu0 %v51_v16 }
  0xc8   :  { %v85_v18 = vpop.f32.mrf.mxu0 }
  0xc9   :  { %v98_v19 = vadd.f32 %v124_v17, %v85_v18 }
  0xcb   :  { %v99_v20 = vmul.f32 0.5, %v98_v19 }
  0xcd   :  { %100 = vst [vmem:[#allocation8] sm:$0xff] %v99_v20 }
  0xce   :  { %111 = dma.vmem_to_hbm [thread:$0]  %s107_s25, 128, %s109_s28, [#allocation5]  }
  0xcf   :  { %201 = dma.done.wait [#allocation5], 128  }
  0xd0   :  { %202 = vsyncadd [#allocation5], 4294967168 }
  0xd1   :  { %116 = vsyncpa [#allocation4], 1 }
  0xd2   :  { %117 = vsyncpa [#allocation7], 1 }
  0xd3   :  { %118 = vsyncpa [#allocation5], 1 }

</bundles_post_ra>
